<compile_context>
chip_gen: v6e
topology: v6e:2x2x1
jax: 0.10.0
libtpu: 0.0.40
codegen_flags: <defaults>
</compile_context>

<pallas_src>
import functools

import jax
import jax.numpy as jnp
from jax.experimental import pallas as pl
from jax.experimental.pallas import tpu as pltpu


def _simplenet_kernel(x_ref, w1_ref, b1_ref, w2_ref, b2_ref, w3_ref, b3_ref,
                      o_ref):
    """Fused SimpleNet forward on one batch tile, batch along lanes.

    x_ref:  [d_in, tb]   (x transposed: batch on lanes)
    wK_ref: [out, in]    (PyTorch nn.Linear layout)
    bK_ref: [out, 1]
    o_ref:  [d_out, tb]
    """
    x_t = x_ref[...]                                      # f32 [d_in, tb]
    d_in = x_t.shape[0]

    # fc1 -> relu. d_in is tiny (2 for moon data), so do it on the VPU as an
    # outer-product accumulate instead of a heavily padded K=2 MXU pass.
    if d_in <= 8:
        w1 = w1_ref[...]                                  # [d_h, d_in]
        h = b1_ref[...]                                   # [d_h, 1] -> lanes
        for k in range(d_in):                             # static unroll
            h = h + w1[:, k:k + 1] * x_t[k:k + 1, :]
    else:
        h = jnp.dot(w1_ref[...], x_t,
                    preferred_element_type=jnp.float32) + b1_ref[...]
    h = jnp.maximum(h, 0.0)                               # [d_h, tb]

    # fc2 -> relu  (MXU, f32 accumulate)
    h = jnp.dot(w2_ref[...], h, preferred_element_type=jnp.float32)
    h = jnp.maximum(h + b2_ref[...], 0.0)

    # fc3 -> relu -> sigmoid (lane-dense [d_out, tb] store)
    h = jnp.dot(w3_ref[...], h, preferred_element_type=jnp.float32)
    h = jnp.maximum(h + b3_ref[...], 0.0)
    o_ref[...] = jax.nn.sigmoid(h).astype(o_ref.dtype)


@functools.partial(jax.jit, static_argnames=("block_b",))
def simplenet_forward(x, w1, b1, w2, b2, w3, b3, *, block_b=128):
    """x: [B, d_in] f32; wK: [out, in] f32 (PyTorch layout); bK: [out] f32.

    Returns [B, d_out] f32 = sigmoid(relu(fc3(relu(fc2(relu(fc1(x))))))).
    block_b must be a multiple of 128 (batch maps to lanes).
    """
    B, d_in = x.shape
    d_h = w1.shape[0]
    d_out = w3.shape[0]
    assert block_b % 128 == 0, "block_b must be a multiple of 128 (lane dim)"

    # Batch on lanes: x is transposed once in the wrapper (~8*B bytes); biases
    # are reshaped to column vectors so they broadcast over lanes in-kernel.
    x_t = x.T                                             # [d_in, B]
    b1c = b1.reshape(d_h, 1)
    b2c = b2.reshape(d_h, 1)
    b3c = b3.reshape(d_out, 1)

    grid = (pl.cdiv(B, block_b),)   # ragged final block handled by Pallas
    rep = lambda i: (0, 0)          # weights/biases are grid-invariant

    flops = 2 * B * (d_in * d_h + d_h * d_h + d_h * d_out)
    bytes_accessed = 4 * (x.size + w1.size + w2.size + w3.size +
                          b1.size + b2.size + b3.size + B * d_out)

    out_t = pl.pallas_call(
        _simplenet_kernel,
        out_shape=jax.ShapeDtypeStruct((d_out, B), jnp.float32),
        grid_spec=pl.GridSpec(
            grid=grid,
            in_specs=[
                pl.BlockSpec((d_in, block_b), lambda i: (0, i)),   # x_t
                pl.BlockSpec((d_h, d_in), rep),                    # w1
                pl.BlockSpec((d_h, 1), rep),                       # b1
                pl.BlockSpec((d_h, d_h), rep),                     # w2
                pl.BlockSpec((d_h, 1), rep),                       # b2
                pl.BlockSpec((d_out, d_h), rep),                   # w3
                pl.BlockSpec((d_out, 1), rep),                     # b3
            ],
            out_specs=pl.BlockSpec((d_out, block_b), lambda i: (0, i)),
        ),
        compiler_params=pltpu.CompilerParams(
            dimension_semantics=("parallel",),
            vmem_limit_bytes=4 * 1024 * 1024),
        cost_estimate=pl.CostEstimate(
            flops=int(flops),
            transcendentals=int(B * d_out),
            bytes_accessed=int(bytes_accessed)),
    )(x_t, w1, b1c, w2, b2c, w3, b3c)

    return out_t.T                                        # [B, d_out]


def init_params(key, input_dim, hidden_dim, output_dim):
    """Deterministic, PyTorch-Linear-style init. Weights in [out, in] layout."""
    ks = jax.random.split(key, 6)

    def linear(kw, kb, fan_in, fan_out):
        bound = 1.0 / jnp.sqrt(fan_in)
        w = jax.random.uniform(kw, (fan_out, fan_in), jnp.float32,
                               -bound, bound)
        b = jax.random.uniform(kb, (fan_out,), jnp.float32, -bound, bound)
        return w, b

    w1, b1 = linear(ks[0], ks[1], input_dim, hidden_dim)
    w2, b2 = linear(ks[2], ks[3], hidden_dim, hidden_dim)
    w3, b3 = linear(ks[4], ks[5], hidden_dim, output_dim)
    return w1, b1, w2, b2, w3, b3


if __name__ == "__main__":
    # Moon data: 2 input features, 1 sigmoid output; hidden=32.
    input_dim, hidden_dim, output_dim = 2, 32, 1
    batch = 200  # not a multiple of block_b -> exercises the ragged final block

    key = jax.random.PRNGKey(0)
    k_x, k_p = jax.random.split(key)
    x = jax.random.normal(k_x, (batch, input_dim), jnp.float32)
    params = init_params(k_p, input_dim, hidden_dim, output_dim)

    out = simplenet_forward(x, *params, block_b=128)  # grid = (2,)
    out = jax.block_until_ready(out)

    # Pure-JAX f32 reference == PyTorch eval-mode forward (x @ W.T + b).
    w1, b1, w2, b2, w3, b3 = params
    h = jnp.maximum(x @ w1.T + b1, 0.0)
    h = jnp.maximum(h @ w2.T + b2, 0.0)
    h = jnp.maximum(h @ w3.T + b3, 0.0)
    ref = jax.nn.sigmoid(h)

    assert out.shape == (batch, output_dim)
    max_err = float(jnp.max(jnp.abs(out - ref)))
    assert jnp.allclose(out, ref, atol=1e-3, rtol=1e-3), max_err

    print("KERNEL_OK")
</pallas_src>

<mosaic_0001>
module attributes {stable_mosaic.version = 11 : i64} {
  func.func @_simplenet_kernel(%arg0: i32, %arg1: memref<2x128xf32, #tpu.memory_space<vmem>>, %arg2: memref<32x2xf32, #tpu.memory_space<vmem>>, %arg3: memref<32x1xf32, #tpu.memory_space<vmem>>, %arg4: memref<32x32xf32, #tpu.memory_space<vmem>>, %arg5: memref<32x1xf32, #tpu.memory_space<vmem>>, %arg6: memref<1x32xf32, #tpu.memory_space<vmem>>, %arg7: memref<1x1xf32, #tpu.memory_space<vmem>>, %arg8: memref<1x128xf32, #tpu.memory_space<vmem>>) attributes {dimension_semantics = [#tpu.dimension_semantics<parallel>], iteration_bounds = array<i64: 2>, scalar_prefetch = 0 : i64, scratch_operands = 0 : i64, tpu.core_type = #tpu.core_type<tc>, window_params = [{transform_indices = @transform_0, window_bounds = array<i64: 2, 128>}, {pipeline_mode = #tpu.pipeline_mode<synchronous>, transform_indices = @transform_1, window_bounds = array<i64: 32, 2>}, {pipeline_mode = #tpu.pipeline_mode<synchronous>, transform_indices = @transform_2, window_bounds = array<i64: 32, 1>}, {pipeline_mode = #tpu.pipeline_mode<synchronous>, transform_indices = @transform_3, window_bounds = array<i64: 32, 32>}, {pipeline_mode = #tpu.pipeline_mode<synchronous>, transform_indices = @transform_4, window_bounds = array<i64: 32, 1>}, {pipeline_mode = #tpu.pipeline_mode<synchronous>, transform_indices = @transform_5, window_bounds = array<i64: 1, 32>}, {pipeline_mode = #tpu.pipeline_mode<synchronous>, transform_indices = @transform_6, window_bounds = array<i64: 1, 1>}, {transform_indices = @transform_7, window_bounds = array<i64: 1, 128>}]} {
    %c0 = arith.constant 0 : index
    %c0_0 = arith.constant 0 : index
    %0 = vector.load %arg1[%c0, %c0_0] : memref<2x128xf32, #tpu.memory_space<vmem>>, vector<2x128xf32>
    %c0_1 = arith.constant 0 : index
    %c0_2 = arith.constant 0 : index
    %1 = vector.load %arg2[%c0_1, %c0_2] : memref<32x2xf32, #tpu.memory_space<vmem>>, vector<32x2xf32>
    %c0_3 = arith.constant 0 : index
    %c0_4 = arith.constant 0 : index
    %2 = vector.load %arg3[%c0_3, %c0_4] : memref<32x1xf32, #tpu.memory_space<vmem>>, vector<32x1xf32>
    %3 = vector.extract_strided_slice %1 {offsets = [0, 0], sizes = [32, 1], strides = [1, 1]} : vector<32x2xf32> to vector<32x1xf32>
    %4 = vector.extract_strided_slice %0 {offsets = [0, 0], sizes = [1, 128], strides = [1, 1]} : vector<2x128xf32> to vector<1x128xf32>
    %5 = vector.broadcast %3 : vector<32x1xf32> to vector<32x128xf32>
    %6 = vector.broadcast %4 : vector<1x128xf32> to vector<32x128xf32>
    %7 = arith.mulf %5, %6 : vector<32x128xf32>
    %8 = vector.broadcast %2 : vector<32x1xf32> to vector<32x128xf32>
    %9 = arith.addf %8, %7 : vector<32x128xf32>
    %10 = vector.extract_strided_slice %1 {offsets = [0, 1], sizes = [32, 1], strides = [1, 1]} : vector<32x2xf32> to vector<32x1xf32>
    %11 = vector.extract_strided_slice %0 {offsets = [1, 0], sizes = [1, 128], strides = [1, 1]} : vector<2x128xf32> to vector<1x128xf32>
    %12 = vector.broadcast %10 : vector<32x1xf32> to vector<32x128xf32>
    %13 = vector.broadcast %11 : vector<1x128xf32> to vector<32x128xf32>
    %14 = arith.mulf %12, %13 : vector<32x128xf32>
    %15 = arith.addf %9, %14 : vector<32x128xf32>
    %cst = arith.constant 0.000000e+00 : f32
    %16 = vector.broadcast %cst : f32 to vector<32x128xf32>
    %17 = arith.maximumf %15, %16 : vector<32x128xf32>
    %c0_5 = arith.constant 0 : index
    %c0_6 = arith.constant 0 : index
    %18 = vector.load %arg4[%c0_5, %c0_6] : memref<32x32xf32, #tpu.memory_space<vmem>>, vector<32x32xf32>
    %cst_7 = arith.constant dense<0.000000e+00> : vector<32x128xf32>
    %19 = tpu.matmul %18, %17, %cst_7 {dimension_numbers = #tpu.dot_dimension_numbers<[1], [0], [0], [1], [0, 0, 1, 1], [], []>} : vector<32x32xf32>, vector<32x128xf32>, vector<32x128xf32> -> vector<32x128xf32>
    %c0_8 = arith.constant 0 : index
    %c0_9 = arith.constant 0 : index
    %20 = vector.load %arg5[%c0_8, %c0_9] : memref<32x1xf32, #tpu.memory_space<vmem>>, vector<32x1xf32>
    %21 = vector.broadcast %20 : vector<32x1xf32> to vector<32x128xf32>
    %22 = arith.addf %19, %21 : vector<32x128xf32>
    %cst_10 = arith.constant 0.000000e+00 : f32
    %23 = vector.broadcast %cst_10 : f32 to vector<32x128xf32>
    %24 = arith.maximumf %22, %23 : vector<32x128xf32>
    %c0_11 = arith.constant 0 : index
    %c0_12 = arith.constant 0 : index
    %25 = vector.load %arg6[%c0_11, %c0_12] : memref<1x32xf32, #tpu.memory_space<vmem>>, vector<1x32xf32>
    %cst_13 = arith.constant dense<0.000000e+00> : vector<1x128xf32>
    %26 = tpu.matmul %25, %24, %cst_13 {dimension_numbers = #tpu.dot_dimension_numbers<[1], [0], [0], [1], [0, 0, 1, 1], [], []>} : vector<1x32xf32>, vector<32x128xf32>, vector<1x128xf32> -> vector<1x128xf32>
    %c0_14 = arith.constant 0 : index
    %c0_15 = arith.constant 0 : index
    %27 = vector.load %arg7[%c0_14, %c0_15] : memref<1x1xf32, #tpu.memory_space<vmem>>, vector<1x1xf32>
    %28 = vector.broadcast %27 : vector<1x1xf32> to vector<1x128xf32>
    %29 = arith.addf %26, %28 : vector<1x128xf32>
    %cst_16 = arith.constant 0.000000e+00 : f32
    %30 = vector.broadcast %cst_16 : f32 to vector<1x128xf32>
    %31 = arith.maximumf %29, %30 : vector<1x128xf32>
    %32 = arith.negf %31 : vector<1x128xf32>
    %33 = math.exp %32 : vector<1x128xf32>
    %cst_17 = arith.constant 1.000000e+00 : f32
    %34 = vector.broadcast %cst_17 : f32 to vector<1x128xf32>
    %35 = arith.addf %34, %33 : vector<1x128xf32>
    %36 = arith.divf %34, %35 : vector<1x128xf32>
    %c0_18 = arith.constant 0 : index
    %c0_19 = arith.constant 0 : index
    %37 = vector.load %arg8[%c0_18, %c0_19] : memref<1x128xf32, #tpu.memory_space<vmem>>, vector<1x128xf32>
    tpu.vector_store %arg8[%c0_18, %c0_19], %36 {strides = array<i32>} : memref<1x128xf32, #tpu.memory_space<vmem>>, vector<1x128xf32>,
    return
  }
  func.func @transform_0(%arg0: i32) -> (i32, i32) {
    %c0_i32 = arith.constant 0 : i32
    %c0_i32_0 = arith.constant 0 : i32
    return %c0_i32, %arg0 : i32, i32
  }
  func.func @transform_1(%arg0: i32) -> (i32, i32) {
    %c0_i32 = arith.constant 0 : i32
    %c0_i32_0 = arith.constant 0 : i32
    %c0_i32_1 = arith.constant 0 : i32
    return %c0_i32, %c0_i32_0 : i32, i32
  }
  func.func @transform_2(%arg0: i32) -> (i32, i32) {
    %c0_i32 = arith.constant 0 : i32
    %c0_i32_0 = arith.constant 0 : i32
    %c0_i32_1 = arith.constant 0 : i32
    return %c0_i32, %c0_i32_0 : i32, i32
  }
  func.func @transform_3(%arg0: i32) -> (i32, i32) {
    %c0_i32 = arith.constant 0 : i32
    %c0_i32_0 = arith.constant 0 : i32
    %c0_i32_1 = arith.constant 0 : i32
    return %c0_i32, %c0_i32_0 : i32, i32
  }
  func.func @transform_4(%arg0: i32) -> (i32, i32) {
    %c0_i32 = arith.constant 0 : i32
    %c0_i32_0 = arith.constant 0 : i32
    %c0_i32_1 = arith.constant 0 : i32
    return %c0_i32, %c0_i32_0 : i32, i32
  }
  func.func @transform_5(%arg0: i32) -> (i32, i32) {
    %c0_i32 = arith.constant 0 : i32
    %c0_i32_0 = arith.constant 0 : i32
    %c0_i32_1 = arith.constant 0 : i32
    return %c0_i32, %c0_i32_0 : i32, i32
  }
  func.func @transform_6(%arg0: i32) -> (i32, i32) {
    %c0_i32 = arith.constant 0 : i32
    %c0_i32_0 = arith.constant 0 : i32
    %c0_i32_1 = arith.constant 0 : i32
    return %c0_i32, %c0_i32_0 : i32, i32
  }
  func.func @transform_7(%arg0: i32) -> (i32, i32) {
    %c0_i32 = arith.constant 0 : i32
    %c0_i32_0 = arith.constant 0 : i32
    return %c0_i32, %arg0 : i32, i32
  }
}

</mosaic_0001>

<bundles_post_ra>
// kernel: simplenet_forward.1
= control target key start
LH: loop header
LB: loop body
LE: loop exit
PB: predicated region body
PF: predicated region fallthrough
CT: control target
= control target key end

     0   :  { %s1030_s0 = inlined_call_operand.vmem [shape: f32[2,200], index: 0, kind: input, shape index: {}]   ;;  %s1031_s1 = inlined_call_operand.vmem [shape: f32[32,2], index: 1, kind: input, shape index: {}]   ;;  %s1032_s2 = inlined_call_operand.vmem [shape: f32[32,1], index: 2, kind: input, shape index: {}]   ;;  %s1033_s3 = inlined_call_operand.vmem [shape: f32[32,32], index: 3, kind: input, shape index: {}]   ;;  %s1034_s4 = inlined_call_operand.vmem [shape: f32[32,1], index: 4, kind: input, shape index: {}]   ;;  %s1035_s5 = inlined_call_operand.vmem [shape: f32[1,32], index: 5, kind: input, shape index: {}]   ;;  %s1036_s6 = inlined_call_operand.<no memory space> [shape: f32[1,1], index: 6, kind: input, shape index: {}]   ;;  %s1037_s7 = inlined_call_operand.hbm [shape: f32[1,200], index: 7, kind: output, shape index: {}]  }
   0x1   :  { %v12_v0 = vstv %s1036_s6 }
   0x2   :  { %13 = vst [vmem:[#allocation2] sm:$0x1] %v12_v0 }
   0x3   :  { %14 = vsyncpa [#allocation4], 0 }
   0x4   :  { %16 = vsyncpa [#allocation4 + $0x1], 0  ;;  %s873_s26 = smov 0   ;;  %s875_s27 = smov 0  }
   0x5   :  { %s877_s28 = smov 0   ;;  %s879_s29 = smov 0  }
   0x6 LB: > { %s894_s6 = sadd.s32 4294967295, %s823_s29   ;;  %s658_s30 = sadd.s32 4294967294, %s823_s29   ;;  %s823_s29 = sphi %s879_s29, %s1043_s29   ;;  %s819_s28 = sphi %s877_s28, %s1042_s28   ;;  %s815_s27 = sphi %s875_s27, %s1041_s27   ;;  %s811_s26 = sphi %s873_s26, %s1040_s26  }
   0x7   : > { %s898_s8 = sadd.s32 1, %s823_s29   ;;  %s181_s9 = sadd.s32 1, %s819_s28 }
   0x8   : > { %s178_s10 = ssub.s32 %s823_s29, %s898_s8  ;;  %p191_p0 = scmp.ne.s32.totalorder %s819_s28, %s815_s27 }
   0x9   : > { %p179_p1 = scmp.eq.s32.totalorder %s178_s10, 0  ;;  %p192_p2 = scmp.eq.s32.totalorder %s894_s6, 1 }
   0xa   : > { %p197_p3 = scmp.ne.s32.totalorder %s815_s27, %s811_s26  ;;  %p198_p4 = scmp.eq.s32.totalorder %s658_s30, 1 }
   0xb   : > { %s909_s11 = scalar_select %p179_p1, %s819_s28, %s181_s9  }
   0xc   : > { %p911_p5 = por %p192_p2, %p191_p0  ;;  %p915_p6 = por %p198_p4, %p197_p3 }
   0xd   : > { %p661_p7 = scmp.ge.s32.totalorder %s823_s29, 1  ;;  %p241_p8 = scmp.lt.s32.totalorder %s823_s29, 3 }
   0xf   : > { %p242_p9 = pnand %p661_p7, %p241_p8 }
  0x10   : > { %p271_p10 = scmp.lt.s32.totalorder (!%p242_p9), %s894_s6, 1  ;;  %s269_s23 = sand.u32 (!%p242_p9), 1, %s815_s27  }
  0x11   : > { %245 = sbr.rel (%p242_p9) target bundleno = 628 (0x274), region = 48  ;;  %s669_s24 = sshll.u32 (!%p242_p9), %s894_s6, 4 }
  0x12   : > { %s591_s15 = scalar_lea.sflag (!%p242_p9), [#allocation4], %s269_s23  ;;  %s829_s17 = smov (!%p242_p9), [#allocation3]  }
  0x13   : > { %s767_s18 = sshll.u32 (!%p242_p9), %s829_s17, 4  ;;  %s768_s18 = int_to_ptr.vmem [resolvable:$false] %s767_s18 }
  0x16   : > { %v283_v1 = vld [vmem:[%s1032_s2 + $0x18] sm:$0xff]  ;;  %v825_v3 = vmov 0   ;;  %v278_v4 = vld [vmem:[%s1031_s1 + $0x10] sm:$0xff]  ;;  %v826_v5 = vmov 1   ;;  %v277_v6 = vld [vmem:[%s1031_s1 + $0x8] sm:$0xff]  ;;  %vm396_vm0 = vcmask 261120   ;;  %v304_v17 = vlaneseq }
  0x17   : > { %v279_v2 = vld [vmem:[%s1031_s1 + $0x18] sm:$0xff]  ;;  %754 = vset.pattern.permute.xlu1 %v825_v3  ;;  %753 = vset.pattern.permute.xlu0 %v825_v3  ;;  %v282_v7 = vld [vmem:[%s1032_s2 + $0x10] sm:$0xff]  ;;  %v276_v8 = vld [vmem:[%s1031_s1] sm:$0xff]  ;;  %s272_s25 = scalar_select %p271_p10, %s894_s6, 1  ;;  %v827_v59 = vmov 0.0   ;;  %vm828_vm1 = vmmov 0  }
  0x18   : > { %329 = vperm.xlu1 %754, %v283_v1   ;;  %301 = vperm.xlu0 %753, %v279_v2   ;;  %v281_v9 = vld [vmem:[%s1032_s2 + $0x8] sm:$0xff]  ;;  %v280_v10 = vld [vmem:[%s1032_s2] sm:$0xff]  ;;  %v375_v11 = vld [vmem:[%s1034_s4 + $0x18] sm:$0xff]  ;;  %v963_v18 = vshrl.u32 %v304_v17, 7  ;;  %s769_s6 = scalar_lea.vmem %s768_s18, 32 }
  0x19   : > { %v368_v12 = vld [vmem:[%s1033_s3] sm:$0xff]  ;;  %v373_v13 = vld [vmem:[%s1034_s4 + $0x8] sm:$0xff]  ;;  %v374_v14 = vld [vmem:[%s1034_s4 + $0x10] sm:$0xff]  ;;  %s662_s30 = sshll.u32 %s272_s25, 1  ;;  %699 = vmatprep.subr.mxu1 %v827_v59  ;;  %707 = vmatprep.mubr.msk.f32.mxu1 %vm828_vm1, %v827_v59  ;;  %s270_s25 = scalar_lea.vmem [#allocation3], %s269_s23 }
  0x1a   : > { %693 = vmatprep.mubr.msk.f32.mxu0 %vm396_vm0, %v368_v12  ;;  %v372_v15 = vld [vmem:[%s1034_s4] sm:$0xff]  ;;  %s274_s14 = scalar_lea.vmem %s1030_s0, %s662_s30  ;;  %v306_v19 = vsub.s32 0, %v963_v18  ;;  %v354_v22 = vsub.s32 1, %v963_v18  ;;  %v369_v56 = vld [vmem:[%s1033_s3 + $0x8] sm:$0xff]  ;;  %v370_v57 = vld [vmem:[%s1033_s3 + $0x10] sm:$0xff]  ;;  %s603_s30 = sshll.u32 %s270_s25, 4  ;;  %s604_s30 = int_to_ptr.vmem [resolvable:$true] %s603_s30 }
  0x1b   : > { %v499_v16 = vld [vmem:[#allocation2] sm:$0x1]  ;;  %v371_v58 = vld [vmem:[%s1033_s3 + $0x18] sm:$0xff]  ;;  %s763_s16 = scalar_lea.vmem %s604_s30, 16  ;;  %p770_p0 = scmp.lt.s32.totalorder %s604_s30, %s768_s18 }
  0x1c   : > { %755 = vset.pattern.permute.xlu1 %v826_v5  ;;  %296 = vperm.xlu0 %753, %v278_v4   ;;  %v275_v20 = vld [vmem:[%s274_s14] sm:$0x3]  ;;  %s995_s14 = scalar_lea.hbm %s1037_s7, %s669_s24  ;;  %p764_p11 = scmp.ne.s32.totalorder %s604_s30, %s763_s16 }
  0x1d   : > { %349 = vperm.xlu1 %755, %v279_v2   ;;  %v307_v21 = vrot.slane %v275_v20, %v306_v19  ;;  %v355_v26 = vrot.slane %v275_v20, %v354_v22  ;;  %v498_v12 = vld [vmem:[%s1035_s5] sm:$0x1]  ;;  %p771_p1 = scmp.lt.s32.totalorder %s769_s6, %s763_s16 }
  0x1e   : > { %p765_p12 = pnand %p764_p11, %p911_p5 }
  0x1f   : > { %p772_p2 = por %p771_p1, %p770_p0 }
  0x20   : > { %291 = vperm.xlu0 %753, %v277_v6   ;;  %p766_p13 = pneg %p765_p12 }
  0x21   : > { %756 = vset.pattern.permute.xlu1 %v825_v3 }
  0x22   : > { %324 = vperm.xlu1 %756, %v282_v7   ;;  %p773_p3 = pnand %p772_p2, %p766_p13 }
  0x24   : > { %757 = vset.pattern.permute.xlu0 %v826_v5 }
  0x25   : > { %345 = vperm.xlu0 %757, %v278_v4  }
  0x26   : > { %286 = vperm.xlu1 %756, %v276_v8  }
  0x29   : > { %341 = vperm.xlu0 %757, %v277_v6  }
  0x2a   : > { %319 = vperm.xlu1 %756, %v281_v9  }
  0x2d   : > { %337 = vperm.xlu0 %757, %v276_v8  }
  0x2e   : > { %314 = vperm.xlu1 %756, %v280_v10  }
  0x31   : > { %758 = vset.pattern.permute.xlu0 %v825_v3 }
  0x32   : > { %393 = vperm.xlu1 %756, %v375_v11   ;;  %388 = vperm.xlu0 %758, %v374_v14  }
  0x36   : > { %383 = vperm.xlu1 %756, %v373_v13   ;;  %502 = vperm.xlu0 %758, %v499_v16  }
  0x3a   : > { %378 = vperm.xlu1 %756, %v372_v15  }
  0x93   : > { %v330_v23 = vpop.permute.xlu1 %329  ;;  %v302_v24 = vpop.permute.xlu0 %301 }
  0x94   : > { %v311_v25 = vmul.f32 %v307_v21, %v302_v24 }
  0x96   : > { %v335_v29 = vadd.f32 %v330_v23, %v311_v25 }
  0x97   : > { %v297_v27 = vpop.permute.xlu0 %296 }
  0x98   : > { %v350_v28 = vpop.permute.xlu1 %349  ;;  %v310_v35 = vmul.f32 %v307_v21, %v297_v27 }
  0x99   : > { %v359_v30 = vmul.f32 %v355_v26, %v350_v28 }
  0x9b   : > { %v292_v31 = vpop.permute.xlu0 %291  ;;  %v363_v32 = vadd.f32 %v359_v30, %v335_v29 }
  0x9c   : > { %v309_v41 = vmul.f32 %v307_v21, %v292_v31 }
  0x9d   : > { %v325_v33 = vpop.permute.xlu1 %324  ;;  %v367_v34 = vmax.f32 %v363_v32, 0.0 }
  0x9e   : > { %v334_v37 = vadd.f32 %v325_v33, %v310_v35 }
  0x9f   : > { %685 = vmatprep.subr.mxu0 %v367_v34 }
  0xa0   : > { %v346_v36 = vpop.permute.xlu0 %345  ;;  %686 = vmatpush3.msra.mxu0 %v367_v34 }
  0xa1   : > { %v358_v38 = vmul.f32 %v355_v26, %v346_v36  ;;  %v287_v39 = vpop.permute.xlu1 %286 }
  0xa2   : > { %v308_v47 = vmul.f32 %v307_v21, %v287_v39 }
  0xa3   : > { %v362_v40 = vadd.f32 %v358_v38, %v334_v37 }
  0xa4   : > { %v342_v42 = vpop.permute.xlu0 %341 }
  0xa5   : > { %v366_v43 = vmax.f32 %v362_v40, 0.0  ;;  %v357_v44 = vmul.f32 %v355_v26, %v342_v42  ;;  %v320_v45 = vpop.permute.xlu1 %319 }
  0xa6   : > { %v333_v46 = vadd.f32 %v320_v45, %v309_v41 }
  0xa7   : > { %687 = vmatprep.subr.mxu0 %v366_v43 }
  0xa8   : > { %v361_v48 = vadd.f32 %v357_v44, %v333_v46  ;;  %v338_v49 = vpop.permute.xlu0 %337  ;;  %688 = vmatpush3.msra.mxu0 %v366_v43 }
  0xa9   : > { %v356_v50 = vmul.f32 %v355_v26, %v338_v49  ;;  %v315_v51 = vpop.permute.xlu1 %314 }
  0xaa   : > { %v365_v52 = vmax.f32 %v361_v48, 0.0  ;;  %v332_v53 = vadd.f32 %v315_v51, %v308_v47 }
  0xac   : > { %v360_v54 = vadd.f32 %v356_v50, %v332_v53  ;;  %689 = vmatprep.subr.mxu0 %v365_v52 }
  0xad   : > { %690 = vmatpush3.msra.mxu0 %v365_v52  ;;  %v394_v60 = vpop.permute.xlu1 %393  ;;  %v389_v2 = vpop.permute.xlu0 %388 }
  0xae   : > { %v364_v55 = vmax.f32 %v360_v54, 0.0 }
  0xb0   : > { %691 = vmatprep.subr.mxu0 %v364_v55 }
  0xb1   : > { %692 = vmatpush3.msra.mxu0 %v364_v55  ;;  %v384_v62 = vpop.permute.xlu1 %383  ;;  %v503_v13 = vpop.permute.xlu0 %502 }
  0xb2   : > { %694 = vmatmul.mubr.msk.f32.vlgmr.msra.gmra.mxu0 %vm396_vm0, %v369_v56  ;;  %v508_v14 = vrot.slane %v503_v13, %v306_v19 }
  0xb3   : > { %696 = vmatprep.mubr.msk.f32.mxu0 %vm396_vm0, %v370_v57 }
  0xb5   : > { %v379_v7 = vpop.permute.xlu1 %378 }
  0xb6   : > { %697 = vmatmul.mubr.msk.f32.gmra.mxu0 %vm396_vm0, %v371_v58 }
 0x172   : > { %v695_v61 = vpop.f32.mrf.mxu0 }
 0x173   : > { %v481_v4 = vadd.f32 %v695_v61, %v384_v62 }
 0x174   : > { %v475_v63 = vpop.f32.mrf.mxu0 }
 0x175   : > { %v476_v8 = vadd.f32 %v475_v63, %v379_v7  ;;  %v495_v10 = vmax.f32 %v481_v4, 0.0 }
 0x176   : > { %v698_v0 = vpop.f32.mrf.mxu0 }
 0x177   : > { %v491_v1 = vadd.f32 %v698_v0, %v394_v60  ;;  %v494_v11 = vmax.f32 %v476_v8, 0.0 }
 0x178   : > { %v485_v3 = vpop.f32.mrf.mxu0 }
 0x179   : > { %v497_v5 = vmax.f32 %v491_v1, 0.0  ;;  %v486_v6 = vadd.f32 %v485_v3, %v389_v2 }
 0x17b   : > { %v496_v9 = vmax.f32 %v486_v6, 0.0  ;;  %700 = vmatpush3.msra.mxu1 %v497_v5 }
 0x17c   : > { %701 = vmatprep.subr.mxu1 %v827_v59 }
 0x17d   : > { %702 = vmatpush3.msra.mxu1 %v496_v9 }
 0x17e   : > { %703 = vmatprep.subr.mxu1 %v827_v59 }
 0x17f   : > { %704 = vmatpush3.msra.mxu1 %v495_v10 }
 0x180   : > { %705 = vmatprep.subr.mxu1 %v827_v59 }
 0x181   : > { %706 = vmatpush3.msra.mxu1 %v494_v11 }
 0x182   : > { %708 = vmatmul.mubr.msk.f32.vlgmr.msra.gmra.mxu1 %vm396_vm0, %v498_v12 }
 0x242   : > { %v578_v15 = vpop.f32.mrf.mxu1 }
 0x243   : > { %v579_v16 = vadd.f32 %v578_v15, %v508_v14 }
 0x244   : > { %v709_v17 = vpop.f32.mrf.mxu1 }
 0x245   : > { %v582_v20 = vmax.f32 %v579_v16, 0.0 }
 0x247   : > { %v668_v21 = vmul.f32 -1.442695, %v582_v20 }
 0x249   : > { %759 = vpow2.f32 %v668_v21 }
 0x256   : > { %v760_v22 = vpop.eup %759 }
 0x257   : > { %v586_v23 = vadd.f32 1.0, %v760_v22 }
 0x259   : > { %761 = vrcp.f32 %v586_v23 }
 0x266   : > { %v762_v18 = vpop.eup %761 }
 0x267   : > { %589 = vst [vmem:[%s270_s25] sm:$0x1] %v762_v18 }
 0x268   : > { %776 = shalt.err (!%p773_p3)
}
 0x269   : > { %s777_s19 = scalar_lea.hbm %s995_s14, 16  ;;  %s781_s22 = scalar_lea.hbm %s1037_s7, 32 }
 0x26a   : > { %p778_p4 = scmp.ne.s32.totalorder %s995_s14, %s777_s19  ;;  %p782_p9 = scmp.lt.s32.totalorder %s995_s14, %s1037_s7 }
 0x26b   : > { %p783_p10 = scmp.lt.s32.totalorder %s781_s22, %s777_s19 }
 0x26c   : > { %p779_p7 = pnand %p778_p4, %p911_p5 }
 0x26d   : > { %p784_p11 = por %p783_p10, %p782_p9 }
 0x26e   : > { %p780_p8 = pneg %p779_p7 }
 0x270   : > { %p785_p12 = pnand %p784_p11, %p780_p8 }
 0x272   : > { %788 = shalt.err (!%p785_p12)
}
 0x273   : > { %710 = dma.vmem_to_hbm [thread:$0]  (%p911_p5), %s604_s30, 16, %s995_s14, %s591_s15  }
 0x274 PF: > { %p716_p13 = scmp.ge.s32.totalorder %s823_s29, 2  ;;  %s615_s25 = sand.u32 1, %s811_s26  }
 0x275   : > { %s616_s9 = scalar_lea.sflag [#allocation4], %s615_s25 }
 0x276   : > { %p713_p0 = pnand %p716_p13, %p915_p6 }
 0x278   : > { %p714_p1 = pneg %p713_p0 }
 0x27a   : > { %806 = dma.done.wait (%p714_p1), %s616_s9, 16  }
 0x27b   : > { %808 = vsyncadd (%p714_p1), %s616_s9, 4294967280  ;;  %p19_p2 = scmp.ge.s32.totalorder %s898_s8, 4   ;;  %s1040_s26 = smov %s815_s27 }
 0x27c   : > { %s1041_s27 = smov %s819_s28  ;;  %s1042_s28 = smov %s909_s11 }
 0x27d   : > { %s1043_s29 = smov %s898_s8  ;;  %21 = sbr.rel (!%p19_p2) target bundleno = 6 (0x6), region = 83 }
 0x282   :  { %620 = vsyncpa [#allocation4], 1 }
 0x283   :  { %622 = vsyncpa [#allocation4 + $0x1], 1 }

</bundles_post_ra>
